<compile_context>
chip_gen: v7x
topology: tpu7x:2x2x1
jax: 0.10.0
libtpu: 0.0.40
codegen_flags: <defaults>
</compile_context>

<pallas_src>
import functools

import jax
import jax.numpy as jnp
from jax import lax
from jax.experimental import pallas as pl
from jax.experimental.pallas import tpu as pltpu


def _selection_tables(h, pad, dtype):
    """wy[s, i, j] = 1 iff j == clamp(i + s - pad, 0, h-1); wxT[s] = wy[s].T."""
    n_shift = 2 * pad + 1
    s = jnp.arange(n_shift, dtype=jnp.int32)[:, None, None]
    i = jnp.arange(h, dtype=jnp.int32)[None, :, None]
    j = jnp.arange(h, dtype=jnp.int32)[None, None, :]
    src = jnp.clip(i + s - pad, 0, h - 1)
    wy = (j == src).astype(dtype)            # (S, h, h): row selection (left multiply)
    wxT = jnp.swapaxes(wy, 1, 2)             # (S, h, h): column selection (right multiply)
    return wy, wxT


def _vmem_capacity_bytes():
    """Generation-aware VMEM capacity (v5e/v6e: 128 MiB, v7x: 64 MiB); safe fallback."""
    try:
        return int(pltpu.get_tpu_info().vmem_capacity_bytes)
    except Exception:
        return 64 << 20   # conservative (v7x-sized) fallback


def _pick_group(n, c, h, w, itemsize, pad):
    """Samples per grid step + scoped-VMEM limit.

    Picks the largest group such that (a) the grid still has >= 2 steps (>= 4 when n
    allows) so pipelining and the v7x second TensorCore stay active, and (b) the
    double-buffered in+out blocks plus the resident selection tables fit a
    generation-aware VMEM budget.
    """
    per_sample = c * h * w * itemsize                      # one sample's in (== out) block row
    table_bytes = 2 * (2 * pad + 1) * h * h * itemsize     # wy + wxT tables (single copy)
    vmem_cap = _vmem_capacity_bytes()
    # ~16 MiB of double-buffered in+out blocks on 128 MiB chips, ~8 MiB on v7x.
    block_budget = min(32 << 20, vmem_cap // 8)
    usable = max(4 * per_sample, block_budget - 2 * table_bytes)
    g_vmem = max(1, usable // (4 * per_sample))            # 2 buffers x (in + out)
    # Guarantee a multi-step grid: >= 4 steps when n >= 4, >= 2 steps otherwise.
    g_steps = max(1, n // 4) if n >= 4 else max(1, n // 2)
    group = int(max(1, min(g_vmem, g_steps, n)))
    # Scoped-VMEM limit: blocks + double-buffered tables + scratch headroom, clamped
    # well below physical capacity (also lifts v5e's 16 MiB default scoped limit).
    needed = 4 * group * per_sample + 4 * table_bytes + (8 << 20)
    vmem_limit = int(min(vmem_cap * 3 // 4, max(32 << 20, needed)))
    return group, vmem_limit


def _make_kernel(n, c, h, w, group, out_dtype):
    def kernel(shift_ref, x_ref, wy_tab_ref, wxT_tab_ref, o_ref):
        blk = pl.program_id(0)

        def body(g, carry):
            b = blk * group + g

            @pl.when(b < n)                    # tail guard for the ragged last block
            def _():
                sx = shift_ref[0, b]           # x-shift (torch grid[..., 0], width)
                sy = shift_ref[1, b]           # y-shift (torch grid[..., 1], height)
                wy = wy_tab_ref[sy]            # (h, h) dynamic first-axis read (resident)
                wxT = wxT_tab_ref[sx]          # (w, w)
                xf = x_ref[g]                  # (c*h, w), input dtype (no up-cast)
                # x-side: all channels in ONE MXU matmul.  HIGHEST precision keeps the
                # 0/1 selection bit-exact for f32 pixels (default rounds through bf16).
                t = jnp.dot(xf, wxT,
                            preferred_element_type=jnp.float32,
                            precision=lax.Precision.HIGHEST).astype(xf.dtype)
                # y-side: per-channel selection, each result stored straight into its
                # static, sublane-aligned slice of the output block (no concatenate).
                for ci in range(c):            # c is small & static
                    r = jnp.dot(wy, t[ci * h:(ci + 1) * h, :],
                                preferred_element_type=jnp.float32,
                                precision=lax.Precision.HIGHEST)
                    o_ref[g, pl.ds(ci * h, h), :] = r.astype(out_dtype)

            return carry

        # fori_loop (not a Python unroll) keeps the per-sample vreg footprint constant
        # so larger groups from the VMEM budget do not spill.
        lax.fori_loop(0, group, body, 0, unroll=2 if group >= 2 else 1)

    return kernel


@functools.partial(jax.jit, static_argnames=("pad",))
def random_shifts_aug(x, shift, pad):
    """Pallas equivalent of RandomShiftsAug.forward.

    x:     (n, c, h, w) float array, h == w (NCHW, like PyTorch)
    shift: (n, 2) int32, values in [0, 2*pad]; shift[:, 0] = x-shift, shift[:, 1] = y-shift
           (same convention as torch.randint(..., size=(n, 1, 1, 2)))
    """
    n, c, h, w = x.shape
    assert h == w
    itemsize = x.dtype.itemsize
    group, vmem_limit = _pick_group(n, c, h, w, itemsize, pad)
    grid = pl.cdiv(n, group)                               # ragged tail handled in-kernel

    wy_tab, wxT_tab = _selection_tables(h, pad, x.dtype)   # hoisted out of the kernel
    shift2 = jnp.transpose(shift.astype(jnp.int32))        # (2, n): long axis last (SMEM)
    x_flat = x.reshape(n, c * h, w)                        # free reshape in NCHW layout

    n_shift = 2 * pad + 1
    kernel = _make_kernel(n, c, h, w, group, x.dtype)
    grid_spec = pltpu.PrefetchScalarGridSpec(
        num_scalar_prefetch=1,
        grid=(grid,),
        in_specs=[
            pl.BlockSpec((group, c * h, w), lambda i, s: (i, 0, 0)),
            # Selection tables: constant block index -> resident in VMEM across steps.
            # (Their footprint is tiny and is accounted for in the VMEM budget; on v7x
            # they could additionally be single-buffered via pipeline_mode.)
            pl.BlockSpec((n_shift, h, h), lambda i, s: (0, 0, 0)),
            pl.BlockSpec((n_shift, h, h), lambda i, s: (0, 0, 0)),
        ],
        out_specs=pl.BlockSpec((group, c * h, w), lambda i, s: (i, 0, 0)),
    )
    cost = pl.CostEstimate(
        flops=2 * n * c * h * w * (w + h),
        transcendentals=0,
        bytes_accessed=2 * n * c * h * w * itemsize
        + 2 * n_shift * h * h * itemsize
        + 2 * n * 4,
    )
    out = pl.pallas_call(
        kernel,
        out_shape=jax.ShapeDtypeStruct((n, c * h, w), x.dtype),
        grid_spec=grid_spec,
        compiler_params=pltpu.CompilerParams(
            dimension_semantics=("parallel",),   # independent samples -> v7x megacore
            vmem_limit_bytes=vmem_limit,
        ),
        cost_estimate=cost,
    )(shift2, x_flat, wy_tab, wxT_tab)
    return out.reshape(n, c, h, w)


if __name__ == "__main__":
    pad = 4
    n, c, h, w = 2, 4, 16, 16
    key = jax.random.PRNGKey(0)
    kx, ks = jax.random.split(key)
    x = jax.random.normal(kx, (n, c, h, w), dtype=jnp.float32)
    # mirrors torch.randint(0, 2*pad + 1, size=(n, 1, 1, 2)) from the module's forward
    # TODO(synk): torch's RNG stream has no Pallas equivalent; shifts are drawn with jax.random.
    shift = jax.random.randint(ks, (n, 2), 0, 2 * pad + 1, dtype=jnp.int32)

    out = jax.block_until_ready(random_shifts_aug(x, shift, pad=pad))

    # reference: the module's exact semantics = integer crop of the replicate-padded image
    xp = jnp.pad(x, ((0, 0), (0, 0), (pad, pad), (pad, pad)), mode="edge")
    ref = jnp.stack([
        xp[b, :,
           int(shift[b, 1]):int(shift[b, 1]) + h,
           int(shift[b, 0]):int(shift[b, 0]) + w]
        for b in range(n)
    ])
    assert out.shape == (n, c, h, w) and out.dtype == x.dtype
    assert jnp.allclose(out, ref, atol=1e-6, rtol=0.0)
    print("KERNEL_OK")
</pallas_src>

<mosaic_0001>
module attributes {stable_mosaic.version = 11 : i64} {
  func.func @kernel(%arg0: i32, %arg1: memref<2x2xi32, #tpu.memory_space<smem>>, %arg2: memref<1x64x16xf32, #tpu.memory_space<vmem>>, %arg3: memref<9x16x16xf32, #tpu.memory_space<vmem>>, %arg4: memref<9x16x16xf32, #tpu.memory_space<vmem>>, %arg5: memref<1x64x16xf32, #tpu.memory_space<vmem>>) attributes {dimension_semantics = [#tpu.dimension_semantics<parallel>], iteration_bounds = array<i64: 2>, scalar_prefetch = 1 : i64, scratch_operands = 0 : i64, tpu.core_type = #tpu.core_type<tc>, window_params = [{transform_indices = @transform_0, window_bounds = array<i64: 1, 64, 16>}, {pipeline_mode = #tpu.pipeline_mode<synchronous>, transform_indices = @transform_1, window_bounds = array<i64: 9, 16, 16>}, {pipeline_mode = #tpu.pipeline_mode<synchronous>, transform_indices = @transform_2, window_bounds = array<i64: 9, 16, 16>}, {transform_indices = @transform_3, window_bounds = array<i64: 1, 64, 16>}]} {
    %c0_i32 = arith.constant 0 : i32
    %c1_i32 = arith.constant 1 : i32
    %0 = arith.muli %arg0, %c1_i32 : i32
    %1 = arith.addi %0, %c0_i32 : i32
    %c2_i32 = arith.constant 2 : i32
    %2 = arith.cmpi slt, %1, %c2_i32 : i32
    %3 = arith.extui %2 : i1 to i32
    %c0_i32_0 = arith.constant 0 : i32
    %4 = arith.cmpi ne, %3, %c0_i32_0 : i32
    scf.if %4 {
      %c0 = arith.constant 0 : index
      %5 = arith.index_cast %1 : i32 to index
      %6 = memref.load %arg1[%c0, %5] : memref<2x2xi32, #tpu.memory_space<smem>>
      %c1 = arith.constant 1 : index
      %7 = arith.index_cast %1 : i32 to index
      %8 = memref.load %arg1[%c1, %7] : memref<2x2xi32, #tpu.memory_space<smem>>
      %9 = arith.index_cast %8 : i32 to index
      %c0_2 = arith.constant 0 : index
      %c0_3 = arith.constant 0 : index
      %10 = vector.load %arg3[%9, %c0_2, %c0_3] : memref<9x16x16xf32, #tpu.memory_space<vmem>>, vector<1x16x16xf32>
      %11 = vector.shape_cast %10 : vector<1x16x16xf32> to vector<16x16xf32>
      %12 = arith.index_cast %6 : i32 to index
      %c0_4 = arith.constant 0 : index
      %c0_5 = arith.constant 0 : index
      %13 = vector.load %arg4[%12, %c0_4, %c0_5] : memref<9x16x16xf32, #tpu.memory_space<vmem>>, vector<1x16x16xf32>
      %14 = vector.shape_cast %13 : vector<1x16x16xf32> to vector<16x16xf32>
      %15 = arith.index_cast %c0_i32 : i32 to index
      %c0_6 = arith.constant 0 : index
      %c0_7 = arith.constant 0 : index
      %16 = vector.load %arg2[%15, %c0_6, %c0_7] : memref<1x64x16xf32, #tpu.memory_space<vmem>>, vector<1x64x16xf32>
      %17 = vector.shape_cast %16 : vector<1x64x16xf32> to vector<64x16xf32>
      %cst = arith.constant dense<0.000000e+00> : vector<64x16xf32>
      %18 = tpu.matmul %17, %14, %cst {dimension_numbers = #tpu.dot_dimension_numbers<[1], [0], [0], [1], [0, 0, 1, 1], [], []>, precision = #tpu.contract_precision<fp32>} : vector<64x16xf32>, vector<16x16xf32>, vector<64x16xf32> -> vector<64x16xf32>
      %19 = vector.extract_strided_slice %18 {offsets = [0, 0], sizes = [16, 16], strides = [1, 1]} : vector<64x16xf32> to vector<16x16xf32>
      %cst_8 = arith.constant dense<0.000000e+00> : vector<16x16xf32>
      %20 = tpu.matmul %11, %19, %cst_8 {dimension_numbers = #tpu.dot_dimension_numbers<[1], [0], [0], [1], [0, 0, 1, 1], [], []>, precision = #tpu.contract_precision<fp32>} : vector<16x16xf32>, vector<16x16xf32>, vector<16x16xf32> -> vector<16x16xf32>
      %21 = arith.index_cast %c0_i32 : i32 to index
      %c0_9 = arith.constant 0 : index
      %c0_10 = arith.constant 0 : index
      %22 = vector.load %arg5[%21, %c0_9, %c0_10] : memref<1x64x16xf32, #tpu.memory_space<vmem>>, vector<1x16x16xf32>
      %23 = vector.shape_cast %22 : vector<1x16x16xf32> to vector<16x16xf32>
      %24 = vector.shape_cast %20 : vector<16x16xf32> to vector<1x16x16xf32>
      tpu.vector_store %arg5[%21, %c0_9, %c0_10], %24 {strides = array<i32>} : memref<1x64x16xf32, #tpu.memory_space<vmem>>, vector<1x16x16xf32>,
      %25 = vector.extract_strided_slice %18 {offsets = [16, 0], sizes = [16, 16], strides = [1, 1]} : vector<64x16xf32> to vector<16x16xf32>
      %cst_11 = arith.constant dense<0.000000e+00> : vector<16x16xf32>
      %26 = tpu.matmul %11, %25, %cst_11 {dimension_numbers = #tpu.dot_dimension_numbers<[1], [0], [0], [1], [0, 0, 1, 1], [], []>, precision = #tpu.contract_precision<fp32>} : vector<16x16xf32>, vector<16x16xf32>, vector<16x16xf32> -> vector<16x16xf32>
      %27 = arith.index_cast %c0_i32 : i32 to index
      %c16 = arith.constant 16 : index
      %c0_12 = arith.constant 0 : index
      %28 = vector.load %arg5[%27, %c16, %c0_12] : memref<1x64x16xf32, #tpu.memory_space<vmem>>, vector<1x16x16xf32>
      %29 = vector.shape_cast %28 : vector<1x16x16xf32> to vector<16x16xf32>
      %30 = vector.shape_cast %26 : vector<16x16xf32> to vector<1x16x16xf32>
      tpu.vector_store %arg5[%27, %c16, %c0_12], %30 {strides = array<i32>} : memref<1x64x16xf32, #tpu.memory_space<vmem>>, vector<1x16x16xf32>,
      %31 = vector.extract_strided_slice %18 {offsets = [32, 0], sizes = [16, 16], strides = [1, 1]} : vector<64x16xf32> to vector<16x16xf32>
      %cst_13 = arith.constant dense<0.000000e+00> : vector<16x16xf32>
      %32 = tpu.matmul %11, %31, %cst_13 {dimension_numbers = #tpu.dot_dimension_numbers<[1], [0], [0], [1], [0, 0, 1, 1], [], []>, precision = #tpu.contract_precision<fp32>} : vector<16x16xf32>, vector<16x16xf32>, vector<16x16xf32> -> vector<16x16xf32>
      %33 = arith.index_cast %c0_i32 : i32 to index
      %c32 = arith.constant 32 : index
      %c0_14 = arith.constant 0 : index
      %34 = vector.load %arg5[%33, %c32, %c0_14] : memref<1x64x16xf32, #tpu.memory_space<vmem>>, vector<1x16x16xf32>
      %35 = vector.shape_cast %34 : vector<1x16x16xf32> to vector<16x16xf32>
      %36 = vector.shape_cast %32 : vector<16x16xf32> to vector<1x16x16xf32>
      tpu.vector_store %arg5[%33, %c32, %c0_14], %36 {strides = array<i32>} : memref<1x64x16xf32, #tpu.memory_space<vmem>>, vector<1x16x16xf32>,
      %37 = vector.extract_strided_slice %18 {offsets = [48, 0], sizes = [16, 16], strides = [1, 1]} : vector<64x16xf32> to vector<16x16xf32>
      %cst_15 = arith.constant dense<0.000000e+00> : vector<16x16xf32>
      %38 = tpu.matmul %11, %37, %cst_15 {dimension_numbers = #tpu.dot_dimension_numbers<[1], [0], [0], [1], [0, 0, 1, 1], [], []>, precision = #tpu.contract_precision<fp32>} : vector<16x16xf32>, vector<16x16xf32>, vector<16x16xf32> -> vector<16x16xf32>
      %39 = arith.index_cast %c0_i32 : i32 to index
      %c48 = arith.constant 48 : index
      %c0_16 = arith.constant 0 : index
      %40 = vector.load %arg5[%39, %c48, %c0_16] : memref<1x64x16xf32, #tpu.memory_space<vmem>>, vector<1x16x16xf32>
      %41 = vector.shape_cast %40 : vector<1x16x16xf32> to vector<16x16xf32>
      %42 = vector.shape_cast %38 : vector<16x16xf32> to vector<1x16x16xf32>
      tpu.vector_store %arg5[%39, %c48, %c0_16], %42 {strides = array<i32>} : memref<1x64x16xf32, #tpu.memory_space<vmem>>, vector<1x16x16xf32>,
    } else {
    }
    %c1_i32_1 = arith.constant 1 : i32
    return
  }
  func.func @transform_0(%arg0: i32, %arg1: memref<2x2xi32, #tpu.memory_space<smem>>) -> (i32, i32, i32) {
    %c0_i32 = arith.constant 0 : i32
    %c0_i32_0 = arith.constant 0 : i32
    %c0_i32_1 = arith.constant 0 : i32
    return %arg0, %c0_i32, %c0_i32_0 : i32, i32, i32
  }
  func.func @transform_1(%arg0: i32, %arg1: memref<2x2xi32, #tpu.memory_space<smem>>) -> (i32, i32, i32) {
    %c0_i32 = arith.constant 0 : i32
    %c0_i32_0 = arith.constant 0 : i32
    %c0_i32_1 = arith.constant 0 : i32
    %c0_i32_2 = arith.constant 0 : i32
    return %c0_i32, %c0_i32_0, %c0_i32_1 : i32, i32, i32
  }
  func.func @transform_2(%arg0: i32, %arg1: memref<2x2xi32, #tpu.memory_space<smem>>) -> (i32, i32, i32) {
    %c0_i32 = arith.constant 0 : i32
    %c0_i32_0 = arith.constant 0 : i32
    %c0_i32_1 = arith.constant 0 : i32
    %c0_i32_2 = arith.constant 0 : i32
    return %c0_i32, %c0_i32_0, %c0_i32_1 : i32, i32, i32
  }
  func.func @transform_3(%arg0: i32, %arg1: memref<2x2xi32, #tpu.memory_space<smem>>) -> (i32, i32, i32) {
    %c0_i32 = arith.constant 0 : i32
    %c0_i32_0 = arith.constant 0 : i32
    %c0_i32_1 = arith.constant 0 : i32
    return %arg0, %c0_i32, %c0_i32_0 : i32, i32, i32
  }
}

</mosaic_0001>

<bundles_post_ra>
// kernel: random_shifts_aug.1
= control target key start
LH: loop header
LB: loop body
LE: loop exit
PB: predicated region body
PF: predicated region fallthrough
CT: control target
= control target key end

     0   :  { %s4272_s0 = inlined_call_operand.vmem [shape: s32[2,2], index: 0, kind: input, shape index: {}]   ;;  %s4273_s1 = inlined_call_operand.vmem [shape: f32[2,64,16], index: 1, kind: input, shape index: {}]   ;;  %s4274_s2 = inlined_call_operand.vmem [shape: f32[9,16,16], index: 2, kind: input, shape index: {}]   ;;  %s4275_s3 = inlined_call_operand.vmem [shape: f32[9,16,16], index: 3, kind: input, shape index: {}]   ;;  %s4276_s4 = inlined_call_operand.hbm [shape: f32[2,64,16], index: 4, kind: output, shape index: {}]  }
   0x1   :  { %s9_s17 = sshll.u32 %s4272_s0, 4  ;;  %s10_s17 = int_to_ptr.vmem [resolvable:$true] %s9_s17 }
   0x2   :  { %s3774_s18 = scalar_lea.vmem %s10_s17, 32  ;;  %p3779_p1 = scmp.lt.s32.totalorder %s10_s17, %s10_s17 }
   0x3   :  { %p3775_p0 = scmp.ne.s32.totalorder %s10_s17, %s3774_s18  ;;  %p3780_p2 = scmp.lt.s32.totalorder %s3774_s18, %s3774_s18 }
   0x5   :  { %p3781_p3 = por %p3780_p2, %p3779_p1 }
   0x7   :  { %p3782_p4 = pnand %p3781_p3, %p3775_p0 }
   0x9   :  { %3785 = shalt.err (!%p3782_p4)  }
   0xa   :  { %s3852_s19 = smov [#allocation3]  }
   0xb   :  { %12 = dma.vmem_to_smem %s10_s17, 32, %s3852_s19, [#allocation2] }
   0xc   :  { %3830 = dma.done.wait [#allocation2], 32 }
   0xd   :  { %3831 = vsyncadd [#allocation2], 4294967264 }
   0xe   :  { %14 = sfence }
   0xf   :  { %15 = vsyncpa [#allocation5], 0 }
  0x10   :  { %17 = vsyncpa [#allocation5 + $0x1], 0  ;;  %s3884_s20 = smov 0   ;;  %s3886_s21 = smov 0  }
  0x11   :  { %s3888_s0 = smov 0   ;;  %s3890_s22 = smov 0  }
  0x12 LB: > { %s3905_s23 = sadd.s32 4294967295, %s3850_s22   ;;  %s3092_s24 = sadd.s32 4294967294, %s3850_s22   ;;  %s3850_s22 = sphi %s3890_s22, %s4282_s22   ;;  %s3846_s0 = sphi %s3888_s0, %s4281_s0   ;;  %s3842_s21 = sphi %s3886_s21, %s4280_s21   ;;  %s3838_s20 = sphi %s3884_s20, %s4279_s20  }
  0x13   : > { %s3909_s25 = sadd.s32 1, %s3850_s22   ;;  %s98_s26 = sadd.s32 1, %s3846_s0 }
  0x14   : > { %s95_s27 = ssub.s32 %s3850_s22, %s3909_s25  ;;  %p108_p5 = scmp.ne.s32.totalorder %s3846_s0, %s3842_s21 }
  0x15   : > { %p96_p6 = scmp.eq.s32.totalorder %s95_s27, 0  ;;  %p109_p7 = scmp.eq.s32.totalorder %s3905_s23, 1 }
  0x16   : > { %p114_p8 = scmp.ne.s32.totalorder %s3842_s21, %s3838_s20  ;;  %p115_p9 = scmp.eq.s32.totalorder %s3092_s24, 1 }
  0x17   : > { %s3920_s28 = scalar_select %p96_p6, %s3846_s0, %s98_s26  }
  0x18   : > { %p3922_p10 = por %p109_p7, %p108_p5  ;;  %p3926_p11 = por %p115_p9, %p114_p8 }
  0x19   : > { %p3095_p12 = scmp.ge.s32.totalorder %s3850_s22, 1  ;;  %p147_p13 = scmp.lt.s32.totalorder %s3850_s22, 3 }
  0x1b   : > { %p148_p0 = pnand %p3095_p12, %p147_p13 }
  0x1c   : > { %s168_s5 = sand.u32 (!%p148_p0), 1, %s3842_s21   ;;  %p171_p1 = scmp.lt.s32.totalorder (!%p148_p0), %s3905_s23, 1 }
  0x1d   : > { %151 = sbr.rel (%p148_p0) target bundleno = 767 (0x2ff), region = 32  ;;  %s3096_s6 = sshll.u32 (!%p148_p0), %s168_s5, 6 }
  0x1e   : > { %s3940_s12 = scalar_lea.vmem (!%p148_p0), [#allocation4], %s3096_s6  ;;  %p3099_p2 = scmp.ge.s32.totalorder (!%p148_p0), %s3905_s23, 2 }
  0x24   : > { %s172_s7 = scalar_select %p171_p1, %s3905_s23, 1 }
  0x25   : > { %179 = sbr.rel (%p3099_p2) target bundleno = 742 (0x2e6), region = 36  ;;  %s3944_s13 = sld [smem:[#allocation3 + %s3905_s23]] (!%p3099_p2)  ;;  %vm205_vm0 = vcmask (!%p3099_p2), 130048  }
  0x26   : > { %s3108_s8 = sshll.u32 %s172_s7, 6  ;;  %s181_s18 = sshra.s32 (!%p3099_p2), %s3905_s23, 7 }
  0x27   : > { %s175_s11 = scalar_lea.vmem %s4273_s1, %s3108_s8  ;;  %s3109_s19 = sshll.u32 (!%p3099_p2), %s181_s18, 7 }
  0x28   : > { %v197_v0 = vld [vmem:[%s175_s11] sm:$0xff] (!%p3099_p2)  ;;  %v198_v1 = vld [vmem:[%s175_s11 + $0x8] sm:$0xff] (!%p3099_p2)  ;;  %v199_v2 = vld [vmem:[%s175_s11 + $0x10] sm:$0xff] (!%p3099_p2)  ;;  %s3110_s24 = sadd.s32 (!%p3099_p2), 128, %s3109_s19  ;;  %s186_s26 = sand.u32 (!%p3099_p2), 127, %s3905_s23 }
  0x29   : > { %v207_v3 = vsel (!%p3099_p2), %vm205_vm0, %v197_v0, 0  ;;  %v210_v4 = vsel (!%p3099_p2), %vm205_vm0, %v198_v1, 0  ;;  %v213_v5 = vsel (!%p3099_p2), %vm205_vm0, %v199_v2, 0  ;;  %v200_v6 = vld [vmem:[%s175_s11 + $0x18] sm:$0xff] (!%p3099_p2)  ;;  %v201_v7 = vld [vmem:[%s175_s11 + $0x20] sm:$0xff] (!%p3099_p2)  ;;  %v202_v8 = vld [vmem:[%s175_s11 + $0x28] sm:$0xff] (!%p3099_p2)  ;;  %s187_s27 = sadd.s32 (!%p3099_p2), %s3110_s24, %s186_s26 }
  0x2a   : > { %v3949_v9 = vand.u32 (!%p3099_p2), 4294901760, %v207_v3  ;;  %v3951_v10 = vand.u32 (!%p3099_p2), 4294901760, %v210_v4  ;;  %v3953_v11 = vand.u32 (!%p3099_p2), 4294901760, %v213_v5  ;;  %v216_v12 = vsel (!%p3099_p2), %vm205_vm0, %v200_v6, 0  ;;  %v203_v13 = vld [vmem:[%s175_s11 + $0x30] sm:$0xff] (!%p3099_p2)  ;;  %v204_v14 = vld [vmem:[%s175_s11 + $0x38] sm:$0xff] (!%p3099_p2) }
  0x2b   : > { %v3956_v15 = vand.u32 (!%p3099_p2), 4294901760, %v216_v12  ;;  %v219_v16 = vsel (!%p3099_p2), %vm205_vm0, %v201_v7, 0  ;;  %v222_v17 = vsel (!%p3099_p2), %vm205_vm0, %v202_v8, 0  ;;  %v225_v18 = vsel (!%p3099_p2), %vm205_vm0, %v203_v13, 0  ;;  %s3102_s14 = sshll.u32 (!%p3099_p2), %s3944_s13, 4  ;;  %s188_s6 = sld [smem:[#allocation3 + %s187_s27]] (!%p3099_p2) }
  0x2c   : > { %v3962_v19 = vsub.f32 %v207_v3, %v3949_v9  ;;  %v3965_v20 = vsub.f32 %v210_v4, %v3951_v10  ;;  %v3968_v21 = vsub.f32 %v213_v5, %v3953_v11  ;;  %v3970_v22 = vand.u32 4294901760, %v219_v16  ;;  %s194_s17 = scalar_lea.vmem %s4275_s3, %s3102_s14 }
  0x2d   : > { %v3973_v23 = vsub.f32 %v216_v12, %v3956_v15  ;;  %v3975_v24 = vand.u32 4294901760, %v222_v17  ;;  %v3977_v25 = vand.u32 4294901760, %v225_v18  ;;  %v228_v26 = vsel %vm205_vm0, %v204_v14, 0  ;;  %v195_v31 = vld [vmem:[%s194_s17] sm:$0xff]  ;;  %v196_v32 = vld [vmem:[%s194_s17 + $0x8] sm:$0xff] }
  0x2e   : > { %v299_v27 = vand.u32 4294901760, %v3962_v19  ;;  %v309_v28 = vand.u32 4294901760, %v3965_v20  ;;  %v319_v29 = vand.u32 4294901760, %v3968_v21  ;;  %v3985_v30 = vsub.f32 %v219_v16, %v3970_v22 }
  0x2f   : > { %v329_v34 = vand.u32 4294901760, %v3973_v23  ;;  %v3995_v35 = vsub.f32 %v222_v17, %v3975_v24  ;;  %v231_v36 = vand.u32 4294901760, %v195_v31  ;;  %v234_v37 = vand.u32 4294901760, %v196_v32 }
  0x30   : > { %v300_v33 = vsub.f32 %v3962_v19, %v299_v27  ;;  %v310_v38 = vsub.f32 %v3965_v20, %v309_v28  ;;  %v4000_v39 = vand.u32 4294901760, %v228_v26  ;;  %v320_v41 = vsub.f32 %v3968_v21, %v319_v29 }
  0x31   : > { %v339_v42 = vand.u32 4294901760, %v3985_v30  ;;  %v4007_v43 = vsub.f32 %v225_v18, %v3977_v25  ;;  %v4009_v44 = vpack.c.bf16 %v234_v37, %v231_v36  ;;  %v379_v45 = vsub.f32 %v195_v31, %v231_v36  ;;  %s3101_s7 = sshll.u32 %s188_s6, 4 }
  0x32   : > { %v301_v40 = vand.u32 4294901760, %v300_v33  ;;  %v386_v46 = vsub.f32 %v196_v32, %v234_v37  ;;  %v330_v47 = vsub.f32 %v3973_v23, %v329_v34  ;;  %v349_v48 = vand.u32 4294901760, %v3995_v35  ;;  %s190_s10 = scalar_lea.vmem %s4274_s2, %s3101_s7 }
  0x33   : > { %3533 = vmatprep.subr.bf16.mxu0 %v4009_v44  ;;  %v311_v49 = vand.u32 4294901760, %v310_v38  ;;  %v380_v50 = vand.u32 4294901760, %v379_v45  ;;  %v368_v52 = vsub.f32 %v228_v26, %v4000_v39  ;;  %v321_v53 = vand.u32 4294901760, %v320_v41  ;;  %v191_v8 = vld [vmem:[%s190_s10] sm:$0xff] }
  0x34   : > { %3272 = vmatprep.mubr.f32.mxu0 %v301_v40  ;;  %v387_v51 = vand.u32 4294901760, %v386_v46  ;;  %3535 = vmatpush3.bf16.msra.mxu0 %v4009_v44  ;;  %v340_v54 = vsub.f32 %v3985_v30, %v339_v42  ;;  %v359_v55 = vand.u32 4294901760, %v4007_v43  ;;  %v331_v58 = vand.u32 4294901760, %v330_v47 }
  0x35   : > { %v381_v56 = vsub.f32 %v379_v45, %v380_v50  ;;  %v350_v61 = vsub.f32 %v3995_v35, %v349_v48  ;;  %v369_v62 = vand.u32 4294901760, %v368_v52  ;;  %v3540_v2 = vpack.c.bf16 %v386_v46, %v379_v45 }
  0x36   : > { %v388_v57 = vsub.f32 %v386_v46, %v387_v51  ;;  %v341_v63 = vand.u32 4294901760, %v340_v54  ;;  %v360_v0 = vsub.f32 %v4007_v43, %v359_v55  ;;  %v3548_v7 = vpack.c.bf16 %v387_v51, %v380_v50 }
  0x37   : > { %3273 = vmatmul.mubr.f32.vlgmr.msra.gmra.mrb[0].mxu0 %v311_v49  ;;  %v382_v59 = vand.u32 4294901760, %v381_v56  ;;  %v351_v3 = vand.u32 4294901760, %v350_v61  ;;  %v370_v4 = vsub.f32 %v368_v52, %v369_v62 }
  0x38   : > { %v389_v60 = vand.u32 4294901760, %v388_v57  ;;  %3275 = vmatprep.mubr.f32.mxu0 %v321_v53  ;;  %v361_v5 = vand.u32 4294901760, %v360_v0 }
  0x39   : > { %v371_v6 = vand.u32 4294901760, %v370_v4 }
  0x3a   : > { %v3536_v1 = vpack.c.bf16 %v389_v60, %v382_v59 }
  0x3b   : > { %3276 = vmatmul.mubr.f32.gmra.mrb[2].mxu0 %v331_v58 }
  0x3c   : > { %3537 = vmatprep.subr.bf16.mxu0 %v3536_v1  ;;  %3278 = vmatprep.mubr.f32.mxu0 %v341_v63 }
  0x3d   : > { %3539 = vmatpush3.bf16.msra.mxu0 %v3536_v1 }
  0x3e   : > { %3541 = vmatprep.subr.bf16.mxu0 %v3540_v2 }
  0x3f   : > { %3279 = vmatmul.mubr.f32.gmra.mrb[4].mxu0 %v351_v3 }
  0x40   : > { %3281 = vmatprep.mubr.f32.mxu0 %v361_v5 }
  0x43   : > { %3282 = vmatmul.mubr.f32.gmra.mrb[6].mxu0 %v371_v6 }
  0x44   : > { %3288 = vmatprep.mubr.f32.mxu0 %v3949_v9 }
  0x47   : > { %3289 = vmatmul.mubr.f32.vlgmr.msra.gmra.mrb[0].mxu0 %v3951_v10 }
  0x48   : > { %3291 = vmatprep.mubr.f32.mxu0 %v3953_v11  ;;  %3543 = vmatpush3.bf16.msra.mxu0 %v3540_v2 }
  0x49   : > { %3545 = vmatprep.subr.bf16.mxu0 %v4009_v44 }
  0x4b   : > { %3292 = vmatmul.mubr.f32.gmra.mrb[2].mxu0 %v3956_v15 }
  0x4c   : > { %3294 = vmatprep.mubr.f32.mxu0 %v3970_v22 }
  0x4f   : > { %3295 = vmatmul.mubr.f32.gmra.mrb[4].mxu0 %v3975_v24 }
  0x50   : > { %3297 = vmatprep.mubr.f32.mxu0 %v3977_v25 }
  0x53   : > { %3298 = vmatmul.mubr.f32.gmra.mrb[6].mxu0 %v4000_v39 }
  0x54   : > { %3304 = vmatprep.mubr.f32.mxu0 %v3962_v19 }
  0x57   : > { %3305 = vmatmul.mubr.f32.vlgmr.msra.gmra.mrb[0].mxu0 %v3965_v20 }
  0x58   : > { %3307 = vmatprep.mubr.f32.mxu0 %v3968_v21  ;;  %3547 = vmatpush3.bf16.msra.mxu0 %v4009_v44 }
  0x59   : > { %3549 = vmatprep.subr.bf16.mxu0 %v3548_v7 }
  0x5b   : > { %3308 = vmatmul.mubr.f32.gmra.mrb[2].mxu0 %v3973_v23 }
  0x5c   : > { %3310 = vmatprep.mubr.f32.mxu0 %v3985_v30 }
  0x5f   : > { %3311 = vmatmul.mubr.f32.gmra.mrb[4].mxu0 %v3995_v35 }
  0x60   : > { %3313 = vmatprep.mubr.f32.mxu0 %v4007_v43 }
  0x63   : > { %3314 = vmatmul.mubr.f32.gmra.mrb[6].mxu0 %v368_v52 }
  0x64   : > { %3320 = vmatprep.mubr.f32.mxu0 %v299_v27 }
  0x67   : > { %3321 = vmatmul.mubr.f32.vlgmr.msra.gmra.mrb[0].mxu0 %v309_v28 }
  0x68   : > { %3323 = vmatprep.mubr.f32.mxu0 %v319_v29  ;;  %3551 = vmatpush3.bf16.msra.mxu0 %v3548_v7 }
  0x69   : > { %3553 = vmatprep.subr.bf16.mxu0 %v4009_v44 }
  0x6b   : > { %3324 = vmatmul.mubr.f32.gmra.mrb[2].mxu0 %v329_v34 }
  0x6c   : > { %3326 = vmatprep.mubr.f32.mxu0 %v339_v42 }
  0x6f   : > { %3327 = vmatmul.mubr.f32.gmra.mrb[4].mxu0 %v349_v48 }
  0x70   : > { %3329 = vmatprep.mubr.f32.mxu0 %v359_v55 }
  0x73   : > { %3330 = vmatmul.mubr.f32.gmra.mrb[6].mxu0 %v369_v62 }
  0x74   : > { %3336 = vmatprep.mubr.f32.mxu0 %v3949_v9 }
  0x77   : > { %3337 = vmatmul.mubr.f32.vlgmr.msra.gmra.mrb[0].mxu0 %v3951_v10 }
  0x78   : > { %3339 = vmatprep.mubr.f32.mxu0 %v3953_v11  ;;  %3555 = vmatpush3.bf16.msra.mxu0 %v4009_v44 }
  0x7b   : > { %3340 = vmatmul.mubr.f32.gmra.mrb[2].mxu0 %v3956_v15 }
  0x7c   : > { %3342 = vmatprep.mubr.f32.mxu0 %v3970_v22 }
  0x7f   : > { %3343 = vmatmul.mubr.f32.gmra.mrb[4].mxu0 %v3975_v24 }
  0x80   : > { %3345 = vmatprep.mubr.f32.mxu0 %v3977_v25 }
  0x83   : > { %3346 = vmatmul.mubr.f32.gmra.mrb[6].mxu0 %v4000_v39 }
  0x84   : > { %3352 = vmatprep.mubr.f32.mxu0 %v3949_v9  ;;  %v991_v9 = vsel %vm205_vm0, %v191_v8, 0 }
  0x87   : > { %3353 = vmatmul.mubr.f32.vlgmr.msra.gmra.mrb[0].mxu0 %v3951_v10  ;;  %v4075_v10 = vand.u32 4294901760, %v991_v9 }
  0x88   : > { %3355 = vmatprep.mubr.f32.mxu0 %v3953_v11 }
  0x89   : > { %v4078_v11 = vsub.f32 %v991_v9, %v4075_v10 }
  0x8b   : > { %3356 = vmatmul.mubr.f32.gmra.mrb[2].mxu0 %v3956_v15  ;;  %v4081_v12 = vand.u32 4294901760, %v4078_v11  ;;  %v192_v15 = vld [vmem:[%s190_s10 + $0x8] sm:$0xff] }
  0x8c   : > { %3358 = vmatprep.mubr.f32.mxu0 %v3970_v22  ;;  %v994_v16 = vsel %vm205_vm0, %v192_v15, 0 }
  0x8d   : > { %v1066_v13 = vsub.f32 %v4078_v11, %v4081_v12  ;;  %v4089_v17 = vand.u32 4294901760, %v994_v16 }
  0x8f   : > { %3359 = vmatmul.mubr.f32.gmra.mrb[4].mxu0 %v3975_v24  ;;  %v4085_v14 = vand.u32 4294901760, %v1066_v13  ;;  %v4092_v18 = vsub.f32 %v994_v16, %v4089_v17 }
  0x90   : > { %3361 = vmatprep.mubr.f32.mxu0 %v3977_v25 }
  0x91   : > { %3368 = vmatprep.mubr.f32.mxu1 %v4085_v14  ;;  %v4095_v19 = vand.u32 4294901760, %v4092_v18 }
  0x93   : > { %3362 = vmatmul.mubr.f32.gmra.mrb[6].mxu0 %v4000_v39  ;;  %v1076_v24 = vsub.f32 %v4092_v18, %v4095_v19 }
  0x95   : > { %v4102_v34 = vand.u32 4294901760, %v1076_v24 }
 0x15a   : > { %v3354_v20 = vpop.f32.mrb[0].mxu0 }
 0x15b   : > { %v1000_v21 = vand.u32 4294901760, %v3354_v20  ;;  %v944_v22 = vpop.f32.mrb[1].mxu0 }
 0x15c   : > { %v997_v23 = vand.u32 4294901760, %v944_v22 }
 0x15d   : > { %v1092_v25 = vsub.f32 %v3354_v20, %v1000_v21 }
 0x15e   : > { %v4099_v26 = vpack.c.bf16 %v1000_v21, %v997_v23  ;;  %v1085_v27 = vsub.f32 %v944_v22, %v997_v23  ;;  %v3357_v28 = vpop.f32.mrb[2].mxu0 }
 0x15f   : > { %v1093_v29 = vand.u32 4294901760, %v1092_v25  ;;  %v1504_v30 = vand.u32 4294901760, %v3357_v28  ;;  %v956_v31 = vpop.f32.mrb[3].mxu0 }
 0x160   : > { %v1086_v32 = vand.u32 4294901760, %v1085_v27  ;;  %v1501_v33 = vand.u32 4294901760, %v956_v31  ;;  %3557 = vmatprep.subr.bf16.mxu1 %v4099_v26  ;;  %v3564_v35 = vpack.c.bf16 %v1092_v25, %v1085_v27 }
 0x161   : > { %v1094_v36 = vsub.f32 %v1092_v25, %v1093_v29  ;;  %v1596_v37 = vsub.f32 %v3357_v28, %v1504_v30  ;;  %3559 = vmatpush3.bf16.msra.mxu1 %v4099_v26 }
 0x162   : > { %v1087_v38 = vsub.f32 %v1085_v27, %v1086_v32  ;;  %v4105_v39 = vpack.c.bf16 %v1504_v30, %v1501_v33  ;;  %v1589_v40 = vsub.f32 %v956_v31, %v1501_v33  ;;  %v3360_v41 = vpop.f32.mrb[4].mxu0  ;;  %v3572_v42 = vpack.c.bf16 %v1093_v29, %v1086_v32 }
 0x163   : > { %v1597_v43 = vand.u32 4294901760, %v1596_v37  ;;  %v2008_v44 = vand.u32 4294901760, %v3360_v41  ;;  %v968_v45 = vpop.f32.mrb[5].mxu0  ;;  %v1095_v46 = vand.u32 4294901760, %v1094_v36 }
 0x164   : > { %v1590_v47 = vand.u32 4294901760, %v1589_v40  ;;  %v2005_v48 = vand.u32 4294901760, %v968_v45  ;;  %3369 = vmatmul.mubr.f32.vlgmr.msra.gmra.mrb[0].mxu1 %v4102_v34  ;;  %v1088_v49 = vand.u32 4294901760, %v1087_v38  ;;  %v4108_v50 = vpack.c.bf16 %v1596_v37, %v1589_v40 }
 0x165   : > { %v1598_v51 = vsub.f32 %v1596_v37, %v1597_v43  ;;  %v2100_v52 = vsub.f32 %v3360_v41, %v2008_v44  ;;  %3375 = vmatprep.mubr.f32.mxu1 %v4075_v10 }
 0x166   : > { %v1591_v53 = vsub.f32 %v1589_v40, %v1590_v47  ;;  %v4111_v54 = vpack.c.bf16 %v2008_v44, %v2005_v48  ;;  %v2093_v55 = vsub.f32 %v968_v45, %v2005_v48  ;;  %v3363_v56 = vpop.f32.mrb[6].mxu0  ;;  %v3560_v57 = vpack.c.bf16 %v1095_v46, %v1088_v49 }
 0x167   : > { %v2101_v58 = vand.u32 4294901760, %v2100_v52  ;;  %v2512_v59 = vand.u32 4294901760, %v3363_v56  ;;  %v980_v60 = vpop.f32.mrb[7].mxu0  ;;  %v1599_v61 = vand.u32 4294901760, %v1598_v51  ;;  %v3596_v62 = vpack.c.bf16 %v1597_v43, %v1590_v47 }
 0x168   : > { %v2094_v63 = vand.u32 4294901760, %v2093_v55  ;;  %v2509_v0 = vand.u32 4294901760, %v980_v60  ;;  %3561 = vmatprep.subr.bf16.mxu1 %v3560_v57  ;;  %v1592_v1 = vand.u32 4294901760, %v1591_v53  ;;  %v4113_v2 = vpack.c.bf16 %v2100_v52, %v2093_v55 }
 0x169   : > { %v2102_v3 = vsub.f32 %v2100_v52, %v2101_v58  ;;  %v2604_v4 = vsub.f32 %v3363_v56, %v2512_v59  ;;  %3563 = vmatpush3.bf16.msra.mxu1 %v3560_v57 }
 0x16a   : > { %v2095_v5 = vsub.f32 %v2093_v55, %v2094_v63  ;;  %v4115_v6 = vpack.c.bf16 %v2512_v59, %v2509_v0  ;;  %v2597_v7 = vsub.f32 %v980_v60, %v2509_v0  ;;  %3565 = vmatprep.subr.bf16.mxu1 %v3564_v35  ;;  %v3584_v8 = vpack.c.bf16 %v1599_v61, %v1592_v1 }
 0x16b   : > { %v2605_v9 = vand.u32 4294901760, %v2604_v4  ;;  %v2103_v13 = vand.u32 4294901760, %v2102_v3  ;;  %v4117_v15 = vpack.c.bf16 %v2101_v58, %v2094_v63 }
 0x16c   : > { %v2598_v16 = vand.u32 4294901760, %v2597_v7  ;;  %3376 = vmatmul.mubr.f32.vlgmr.msra.gmra.mrb[0].mxu1 %v4089_v17  ;;  %v2096_v20 = vand.u32 4294901760, %v2095_v5  ;;  %v4120_v21 = vpack.c.bf16 %v2604_v4, %v2597_v7 }
 0x16d   : > { %v2606_v22 = vsub.f32 %v2604_v4, %v2605_v9  ;;  %3567 = vmatpush3.bf16.msra.mxu1 %v3564_v35  ;;  %3382 = vmatprep.mubr.f32.mxu1 %v4078_v11 }
 0x16e   : > { %v2599_v23 = vsub.f32 %v2597_v7, %v2598_v16  ;;  %3569 = vmatprep.subr.bf16.mxu1 %v4099_v26  ;;  %v3608_v24 = vpack.c.bf16 %v2103_v13, %v2096_v20  ;;  %v4124_v25 = vpack.c.bf16 %v2605_v9, %v2598_v16 }
 0x16f   : > { %v2607_v27 = vand.u32 4294901760, %v2606_v22 }
 0x170   : > { %v2600_v28 = vand.u32 4294901760, %v2599_v23 }
 0x172   : > { %v4126_v29 = vpack.c.bf16 %v2607_v27, %v2600_v28 }
 0x174   : > { %3383 = vmatmul.mubr.f32.vlgmr.msra.gmra.mrb[0].mxu1 %v4092_v18 }
 0x175   : > { %3571 = vmatpush3.bf16.msra.mxu1 %v4099_v26  ;;  %3389 = vmatprep.mubr.f32.mxu1 %v4081_v12 }
 0x176   : > { %3573 = vmatprep.subr.bf16.mxu1 %v3572_v42 }
 0x17c   : > { %3390 = vmatmul.mubr.f32.vlgmr.msra.gmra.mrb[0].mxu1 %v4095_v19 }
 0x17d   : > { %3575 = vmatpush3.bf16.msra.mxu1 %v3572_v42  ;;  %3396 = vmatprep.mubr.f32.mxu1 %v4075_v10 }
 0x17e   : > { %3577 = vmatprep.subr.bf16.mxu1 %v4099_v26 }
 0x184   : > { %3397 = vmatmul.mubr.f32.vlgmr.msra.gmra.mrb[0].mxu1 %v4089_v17 }
 0x185   : > { %3579 = vmatpush3.bf16.msra.mxu1 %v4099_v26  ;;  %3403 = vmatprep.mubr.f32.mxu1 %v4075_v10 }
 0x186   : > { %3581 = vmatprep.subr.bf16.mxu1 %v4105_v39 }
 0x18c   : > { %3404 = vmatmul.mubr.f32.vlgmr.msra.gmra.mrb[0].mxu1 %v4089_v17 }
 0x18d   : > { %3583 = vmatpush3.bf16.msra.mxu1 %v4105_v39  ;;  %3410 = vmatprep.mubr.f32.mxu1 %v4085_v14 }
 0x18e   : > { %3585 = vmatprep.subr.bf16.mxu1 %v3584_v8 }
 0x190   : > { %3411 = vmatmul.mubr.f32.vlgmr.msra.gmra.mrb[2].mxu1 %v4102_v34 }
 0x191   : > { %3587 = vmatpush3.bf16.msra.mxu1 %v3584_v8  ;;  %3417 = vmatprep.mubr.f32.mxu1 %v4075_v10 }
 0x192   : > { %3589 = vmatprep.subr.bf16.mxu1 %v4108_v50 }
 0x198   : > { %3418 = vmatmul.mubr.f32.vlgmr.msra.gmra.mrb[2].mxu1 %v4089_v17 }
 0x199   : > { %3591 = vmatpush3.bf16.msra.mxu1 %v4108_v50  ;;  %3424 = vmatprep.mubr.f32.mxu1 %v4078_v11 }
 0x19a   : > { %3593 = vmatprep.subr.bf16.mxu1 %v4105_v39 }
 0x1a0   : > { %3425 = vmatmul.mubr.f32.vlgmr.msra.gmra.mrb[2].mxu1 %v4092_v18 }
 0x1a1   : > { %3595 = vmatpush3.bf16.msra.mxu1 %v4105_v39  ;;  %3431 = vmatprep.mubr.f32.mxu1 %v4081_v12 }
 0x1a2   : > { %3597 = vmatprep.subr.bf16.mxu1 %v3596_v62 }
 0x1a8   : > { %3432 = vmatmul.mubr.f32.vlgmr.msra.gmra.mrb[2].mxu1 %v4095_v19 }
 0x1a9   : > { %3599 = vmatpush3.bf16.msra.mxu1 %v3596_v62  ;;  %3438 = vmatprep.mubr.f32.mxu1 %v4075_v10 }
 0x1aa   : > { %3601 = vmatprep.subr.bf16.mxu1 %v4105_v39 }
 0x1b0   : > { %3439 = vmatmul.mubr.f32.vlgmr.msra.gmra.mrb[2].mxu1 %v4089_v17 }
 0x1b1   : > { %3603 = vmatpush3.bf16.msra.mxu1 %v4105_v39  ;;  %3445 = vmatprep.mubr.f32.mxu1 %v4075_v10 }
 0x1b2   : > { %3605 = vmatprep.subr.bf16.mxu1 %v4111_v54 }
 0x1b8   : > { %3446 = vmatmul.mubr.f32.vlgmr.msra.gmra.mrb[2].mxu1 %v4089_v17 }
 0x1b9   : > { %3607 = vmatpush3.bf16.msra.mxu1 %v4111_v54  ;;  %3452 = vmatprep.mubr.f32.mxu1 %v4085_v14 }
 0x1ba   : > { %3609 = vmatprep.subr.bf16.mxu1 %v3608_v24 }
 0x1bc   : > { %3453 = vmatmul.mubr.f32.vlgmr.msra.gmra.mrb[4].mxu1 %v4102_v34 }
 0x1bd   : > { %3611 = vmatpush3.bf16.msra.mxu1 %v3608_v24  ;;  %3459 = vmatprep.mubr.f32.mxu1 %v4075_v10 }
 0x1be   : > { %3613 = vmatprep.subr.bf16.mxu1 %v4113_v2 }
 0x1c4   : > { %3460 = vmatmul.mubr.f32.vlgmr.msra.gmra.mrb[4].mxu1 %v4089_v17 }
 0x1c5   : > { %3615 = vmatpush3.bf16.msra.mxu1 %v4113_v2  ;;  %3466 = vmatprep.mubr.f32.mxu1 %v4078_v11 }
 0x1c6   : > { %3617 = vmatprep.subr.bf16.mxu1 %v4111_v54 }
 0x1cc   : > { %3467 = vmatmul.mubr.f32.vlgmr.msra.gmra.mrb[4].mxu1 %v4092_v18 }
 0x1cd   : > { %3619 = vmatpush3.bf16.msra.mxu1 %v4111_v54  ;;  %3473 = vmatprep.mubr.f32.mxu1 %v4081_v12 }
 0x1ce   : > { %3621 = vmatprep.subr.bf16.mxu1 %v4117_v15 }
 0x1d4   : > { %3474 = vmatmul.mubr.f32.vlgmr.msra.gmra.mrb[4].mxu1 %v4095_v19 }
 0x1d5   : > { %3623 = vmatpush3.bf16.msra.mxu1 %v4117_v15  ;;  %3480 = vmatprep.mubr.f32.mxu1 %v4075_v10 }
 0x1d6   : > { %3625 = vmatprep.subr.bf16.mxu1 %v4111_v54 }
 0x1dc   : > { %3481 = vmatmul.mubr.f32.vlgmr.msra.gmra.mrb[4].mxu1 %v4089_v17 }
 0x1dd   : > { %3627 = vmatpush3.bf16.msra.mxu1 %v4111_v54  ;;  %3487 = vmatprep.mubr.f32.mxu1 %v4075_v10 }
 0x1de   : > { %3629 = vmatprep.subr.bf16.mxu1 %v4115_v6 }
 0x1e4   : > { %3488 = vmatmul.mubr.f32.vlgmr.msra.gmra.mrb[4].mxu1 %v4089_v17 }
 0x1e5   : > { %3631 = vmatpush3.bf16.msra.mxu1 %v4115_v6  ;;  %3494 = vmatprep.mubr.f32.mxu1 %v4085_v14 }
 0x1e6   : > { %3633 = vmatprep.subr.bf16.mxu1 %v4126_v29 }
 0x1e8   : > { %3495 = vmatmul.mubr.f32.vlgmr.msra.gmra.mrb[6].mxu1 %v4102_v34 }
 0x1e9   : > { %3635 = vmatpush3.bf16.msra.mxu1 %v4126_v29  ;;  %3501 = vmatprep.mubr.f32.mxu1 %v4075_v10 }
 0x1ea   : > { %3637 = vmatprep.subr.bf16.mxu1 %v4120_v21 }
 0x1f0   : > { %3502 = vmatmul.mubr.f32.vlgmr.msra.gmra.mrb[6].mxu1 %v4089_v17 }
 0x1f1   : > { %3639 = vmatpush3.bf16.msra.mxu1 %v4120_v21  ;;  %3508 = vmatprep.mubr.f32.mxu1 %v4078_v11 }
 0x1f2   : > { %3641 = vmatprep.subr.bf16.mxu1 %v4115_v6 }
 0x1f8   : > { %3509 = vmatmul.mubr.f32.vlgmr.msra.gmra.mrb[6].mxu1 %v4092_v18 }
 0x1f9   : > { %3643 = vmatpush3.bf16.msra.mxu1 %v4115_v6  ;;  %3515 = vmatprep.mubr.f32.mxu1 %v4081_v12 }
 0x1fa   : > { %3645 = vmatprep.subr.bf16.mxu1 %v4124_v25 }
 0x200   : > { %3516 = vmatmul.mubr.f32.vlgmr.msra.gmra.mrb[6].mxu1 %v4095_v19 }
 0x201   : > { %3647 = vmatpush3.bf16.msra.mxu1 %v4124_v25  ;;  %3522 = vmatprep.mubr.f32.mxu1 %v4075_v10 }
 0x202   : > { %3649 = vmatprep.subr.bf16.mxu1 %v4115_v6 }
 0x208   : > { %3523 = vmatmul.mubr.f32.vlgmr.msra.gmra.mrb[6].mxu1 %v4089_v17 }
 0x209   : > { %3651 = vmatpush3.bf16.msra.mxu1 %v4115_v6  ;;  %3529 = vmatprep.mubr.f32.mxu1 %v4075_v10 }
 0x210   : > { %3530 = vmatmul.mubr.f32.vlgmr.msra.gmra.mrb[6].mxu1 %v4089_v17 }
 0x25f   : > { %v3405_v11 = vpop.f32.mrb[0].mxu1 }
 0x260   : > { %1499 = vst.msk [vmem:[%s3940_s12 + $0x8] sm:$0xff] %vm205_vm0, %v3405_v11  ;;  %v1488_v12 = vpop.f32.mrb[1].mxu1 }
 0x261   : > { %1498 = vst.msk [vmem:[%s3940_s12] sm:$0xff] %vm205_vm0, %v1488_v12 }
 0x28b   : > { %v3447_v14 = vpop.f32.mrb[2].mxu1 }
 0x28c   : > { %2003 = vst.msk [vmem:[%s3940_s12 + $0x18] sm:$0xff] %vm205_vm0, %v3447_v14  ;;  %v1992_v18 = vpop.f32.mrb[3].mxu1 }
 0x28d   : > { %2002 = vst.msk [vmem:[%s3940_s12 + $0x10] sm:$0xff] %vm205_vm0, %v1992_v18 }
 0x2b7   : > { %v3489_v19 = vpop.f32.mrb[4].mxu1 }
 0x2b8   : > { %2507 = vst.msk [vmem:[%s3940_s12 + $0x28] sm:$0xff] %vm205_vm0, %v3489_v19  ;;  %v2496_v26 = vpop.f32.mrb[5].mxu1 }
 0x2b9   : > { %2506 = vst.msk [vmem:[%s3940_s12 + $0x20] sm:$0xff] %vm205_vm0, %v2496_v26 }
 0x2e3   : > { %v3531_v10 = vpop.f32.mrb[6].mxu1 }
 0x2e4   : > { %3011 = vst.msk [vmem:[%s3940_s12 + $0x38] sm:$0xff] %vm205_vm0, %v3531_v10  ;;  %v3000_v17 = vpop.f32.mrb[7].mxu1 }
 0x2e5   : > { %3010 = vst.msk [vmem:[%s3940_s12 + $0x30] sm:$0xff] %vm205_vm0, %v3000_v17 }
 0x2e6 PF: > { %s3111_s11 = sshll.u32 %s3905_s23, 10  ;;  %s3026_s16 = sshll.u32 %s3940_s12, 4  ;;  %s4227_s16 = int_to_ptr.vmem [resolvable:$true] %s3026_s16 }
 0x2e7   : > { %s4224_s15 = scalar_lea.hbm %s4276_s4, %s3111_s11  ;;  %s4231_s17 = scalar_lea.sflag [#allocation5], %s168_s5 }
 0x2e8   : > { %s3786_s18 = scalar_lea.vmem %s4227_s16, 1024  ;;  %s3853_s23 = smov [#allocation4]  }
 0x2e9   : > { %p3787_p3 = scmp.ne.s32.totalorder %s4227_s16, %s3786_s18  ;;  %s3790_s19 = sshll.u32 %s3853_s23, 4  ;;  %s3791_s19 = int_to_ptr.vmem [resolvable:$false] %s3790_s19 }
 0x2ea   : > { %s3792_s24 = scalar_lea.vmem %s3791_s19, 2048  ;;  %p3793_p6 = scmp.lt.s32.totalorder %s4227_s16, %s3791_s19 }
 0x2eb   : > { %p3788_p4 = pnand %p3787_p3, %p3922_p10  ;;  %p3794_p7 = scmp.lt.s32.totalorder %s3792_s24, %s3786_s18 }
 0x2ed   : > { %p3789_p5 = pneg %p3788_p4  ;;  %p3795_p8 = por %p3794_p7, %p3793_p6 }
 0x2ef   : > { %p3796_p9 = pnand %p3795_p8, %p3789_p5 }
 0x2f1   : > { %3799 = shalt.err (!%p3796_p9)
}
 0x2f2   : > { %s3800_s5 = scalar_lea.hbm %s4224_s15, 1024  ;;  %s3804_s27 = scalar_lea.hbm %s4276_s4, 2048 }
 0x2f3   : > { %p3801_p12 = scmp.ne.s32.totalorder %s4224_s15, %s3800_s5  ;;  %p3805_p1 = scmp.lt.u32.totalorder %s4224_s15, %s4276_s4 }
 0x2f4   : > { %p3806_p2 = scmp.lt.u32.totalorder %s3804_s27, %s3800_s5  ;;  %p3808_p4 = scmp.lt.u32.totalorder %s3800_s5, %s4224_s15 }
 0x2f5   : > { %p3802_p13 = pnand %p3801_p12, %p3922_p10 }
 0x2f6   : > { %p3807_p3 = por %p3806_p2, %p3805_p1 }
 0x2f7   : > { %p3803_p0 = pneg %p3802_p13 }
 0x2f8   : > { %p3809_p5 = por %p3808_p4, %p3807_p3 }
 0x2fa   : > { %p3810_p6 = pnand %p3809_p5, %p3803_p0 }
 0x2fc   : > { %3813 = shalt.err (!%p3810_p6)
}
 0x2fd   : > { %s3854_s8 = smov 128   ;;  %s3855_s9 = smov 8  }
 0x2fe   : > { %3732 = dma.vmem_to_hbm [thread:$0]  (%p3922_p10), %s4227_s16, 1024, %s4224_s15, %s4231_s17, %s3854_s8, %s3854_s8, %s3855_s9  }
 0x2ff PF: > { %p3738_p7 = scmp.ge.s32.totalorder %s3850_s22, 2  ;;  %s3041_s10 = sand.u32 1, %s3838_s20  }
 0x300   : > { %s3042_s11 = scalar_lea.sflag [#allocation5], %s3041_s10 }
 0x301   : > { %p3735_p8 = pnand %p3738_p7, %p3926_p11 }
 0x303   : > { %3833 = dma.done.wait (!%p3735_p8), %s3042_s11, 1024  }
 0x304   : > { %3835 = vsyncadd (!%p3735_p8), %s3042_s11, 4294966272  ;;  %p20_p9 = scmp.ge.s32.totalorder %s3909_s25, 4   ;;  %s4279_s20 = smov %s3842_s21 }
 0x305   : > { %s4280_s21 = smov %s3846_s0  ;;  %s4281_s0 = smov %s3920_s28 }
 0x306   : > { %s4282_s22 = smov %s3909_s25  ;;  %22 = sbr.rel (!%p20_p9) target bundleno = 18 (0x12), region = 73 }
 0x30d   :  { %3047 = vsyncpa [#allocation5], 1 }
 0x30e   :  { %3049 = vsyncpa [#allocation5 + $0x1], 1 }

</bundles_post_ra>
